<compile_context>
chip_gen: v6e
topology: v6e:2x2x1
jax: 0.10.0
libtpu: 0.0.40
codegen_flags: <defaults>
</compile_context>

<pallas_src>
import functools

import jax
import jax.numpy as jnp
from jax.experimental import pallas as pl
from jax.experimental.pallas import tpu as pltpu

INPUT_DIM = 35
HIDDEN_DIM = 100
OUTPUT_DIM = 2

HIDDEN_PAD = 128      # lane-dense hidden width (100 -> 128, zero padded)
TILE_B_MAX = 2048     # batch rows per grid step; multiple of 512, ~5-6 MiB VMEM


def _round_up(x, m):
    return ((x + m - 1) // m) * m


def mlp_kernel(x_ref, w1_ref, b1_ref, w2_ref, b2_ref, o_ref):
    # fc1: [tile, in] @ [in, hidden_pad] + [1, hidden_pad]   (MXU)
    h = jnp.dot(x_ref[...], w1_ref[...], preferred_element_type=jnp.float32)
    h = h + b1_ref[...]
    # Sigmoid: single EUP logistic op (no VPU divide); matches jax.nn.sigmoid
    # reference bit-for-bit.
    h = jax.nn.sigmoid(h)
    # fc2: [tile, hidden_pad] @ [hidden_pad, out] + [1, out]  (MXU)
    out = jnp.dot(h, w2_ref[...], preferred_element_type=jnp.float32)
    o_ref[...] = (out + b2_ref[...]).astype(o_ref.dtype)


@functools.partial(jax.jit, static_argnames=("tile_b_max",))
def feedforward_nn(x, w1, b1, w2, b2, *, tile_b_max=TILE_B_MAX):
    """x: [B, INPUT_DIM] f32; w1: [INPUT_DIM, HIDDEN_DIM]; b1: [1, HIDDEN_DIM];
    w2: [HIDDEN_DIM, OUTPUT_DIM]; b2: [1, OUTPUT_DIM]. Returns [B, OUTPUT_DIM]."""
    batch = x.shape[0]

    # --- lane-dense hidden padding (100 -> 128); padded region is exact zeros,
    #     so sigmoid(0)*0-rows-of-W2 adds exact 0.0 to the f32 accumulation. ---
    hpad = HIDDEN_PAD - HIDDEN_DIM
    w1p = jnp.pad(w1, ((0, 0), (0, hpad)))
    b1p = jnp.pad(b1, ((0, 0), (0, hpad)))
    w2p = jnp.pad(w2, ((0, hpad), (0, 0)))

    # --- batch tiling ---
    # tile is a multiple of 8 (sublane), as large as TILE_B_MAX allows, but
    # forced to give >= 2 grid steps when batch > 8 so both v7x TensorCores
    # receive work (no-op cost on single-TC v5e/v6e).
    tile_b = min(tile_b_max, _round_up(batch, 8))
    if batch > 8:
        tile_b = min(tile_b, _round_up(-(-batch // 2), 8))
    padded_batch = _round_up(batch, tile_b)
    xp = jnp.pad(x, ((0, padded_batch - batch), (0, 0))) if padded_batch != batch else x
    grid = (padded_batch // tile_b,)

    cost = pl.CostEstimate(
        flops=2 * padded_batch * (INPUT_DIM * HIDDEN_PAD + HIDDEN_PAD * OUTPUT_DIM),
        transcendentals=padded_batch * HIDDEN_PAD,
        bytes_accessed=4 * (padded_batch * (INPUT_DIM + OUTPUT_DIM)
                            + INPUT_DIM * HIDDEN_PAD + HIDDEN_PAD
                            + HIDDEN_PAD * OUTPUT_DIM + OUTPUT_DIM),
    )

    out = pl.pallas_call(
        mlp_kernel,
        out_shape=jax.ShapeDtypeStruct((padded_batch, OUTPUT_DIM), jnp.float32),
        grid=grid,
        in_specs=[
            # x tiles stream over the batch grid axis (auto double-buffered DMA)
            pl.BlockSpec((tile_b, INPUT_DIM), lambda i: (i, 0)),
            # weights / biases resident: same block for every grid step
            pl.BlockSpec((INPUT_DIM, HIDDEN_PAD), lambda i: (0, 0)),
            pl.BlockSpec((1, HIDDEN_PAD), lambda i: (0, 0)),
            pl.BlockSpec((HIDDEN_PAD, OUTPUT_DIM), lambda i: (0, 0)),
            pl.BlockSpec((1, OUTPUT_DIM), lambda i: (0, 0)),
        ],
        # Output intentionally lane-sparse (tile_b, 2): padding to 128 lanes
        # would 64x the output HBM traffic for no gain.
        out_specs=pl.BlockSpec((tile_b, OUTPUT_DIM), lambda i: (i, 0)),
        compiler_params=pltpu.CompilerParams(
            dimension_semantics=("parallel",),   # megacore sharding on v7x
        ),
        cost_estimate=cost,
    )(xp, w1p, b1p, w2p, b2)

    return out[:batch]


def init_params(key):
    # Deterministic init mimicking nn.Linear's U(-1/sqrt(fan_in), 1/sqrt(fan_in)).
    k1, k2, k3, k4 = jax.random.split(key, 4)
    lim1 = 1.0 / jnp.sqrt(jnp.float32(INPUT_DIM))
    lim2 = 1.0 / jnp.sqrt(jnp.float32(HIDDEN_DIM))
    w1 = jax.random.uniform(k1, (INPUT_DIM, HIDDEN_DIM), jnp.float32, -lim1, lim1)
    b1 = jax.random.uniform(k2, (1, HIDDEN_DIM), jnp.float32, -lim1, lim1)
    w2 = jax.random.uniform(k3, (HIDDEN_DIM, OUTPUT_DIM), jnp.float32, -lim2, lim2)
    b2 = jax.random.uniform(k4, (1, OUTPUT_DIM), jnp.float32, -lim2, lim2)
    return w1, b1, w2, b2


def _ref(x, w1, b1, w2, b2):
    return jax.nn.sigmoid(x @ w1 + b1) @ w2 + b2


if __name__ == "__main__":
    key = jax.random.PRNGKey(0)
    kx, kx2, kp = jax.random.split(key, 3)
    w1, b1, w2, b2 = init_params(kp)

    # Small-shape check (single tile).
    batch = 8
    x = jax.random.normal(kx, (batch, INPUT_DIM), dtype=jnp.float32)
    out = feedforward_nn(x, w1, b1, w2, b2)
    jax.block_until_ready(out)
    assert out.shape == (batch, OUTPUT_DIM)
    assert jnp.allclose(out, _ref(x, w1, b1, w2, b2), atol=1e-5, rtol=1e-5)

    # Larger, non-multiple batch to exercise the multi-step grid + padding path.
    batch2 = 1000
    x2 = jax.random.normal(kx2, (batch2, INPUT_DIM), dtype=jnp.float32)
    out2 = feedforward_nn(x2, w1, b1, w2, b2)
    jax.block_until_ready(out2)
    assert out2.shape == (batch2, OUTPUT_DIM)
    assert jnp.allclose(out2, _ref(x2, w1, b1, w2, b2), atol=1e-5, rtol=1e-5)

    print("KERNEL_OK")
</pallas_src>

<mosaic_0001>
module attributes {stable_mosaic.version = 11 : i64} {
  func.func @mlp_kernel(%arg0: i32, %arg1: memref<8x35xf32, #tpu.memory_space<vmem>>, %arg2: memref<35x128xf32, #tpu.memory_space<vmem>>, %arg3: memref<1x128xf32, #tpu.memory_space<vmem>>, %arg4: memref<128x2xf32, #tpu.memory_space<vmem>>, %arg5: memref<1x2xf32, #tpu.memory_space<vmem>>, %arg6: memref<8x2xf32, #tpu.memory_space<vmem>>) attributes {dimension_semantics = [#tpu.dimension_semantics<parallel>], iteration_bounds = array<i64: 1>, scalar_prefetch = 0 : i64, scratch_operands = 0 : i64, tpu.core_type = #tpu.core_type<tc>, window_params = [{transform_indices = @transform_0, window_bounds = array<i64: 8, 35>}, {pipeline_mode = #tpu.pipeline_mode<synchronous>, transform_indices = @transform_1, window_bounds = array<i64: 35, 128>}, {pipeline_mode = #tpu.pipeline_mode<synchronous>, transform_indices = @transform_2, window_bounds = array<i64: 1, 128>}, {pipeline_mode = #tpu.pipeline_mode<synchronous>, transform_indices = @transform_3, window_bounds = array<i64: 128, 2>}, {pipeline_mode = #tpu.pipeline_mode<synchronous>, transform_indices = @transform_4, window_bounds = array<i64: 1, 2>}, {transform_indices = @transform_5, window_bounds = array<i64: 8, 2>}]} {
    %c0 = arith.constant 0 : index
    %c0_0 = arith.constant 0 : index
    %0 = vector.load %arg1[%c0, %c0_0] : memref<8x35xf32, #tpu.memory_space<vmem>>, vector<8x35xf32>
    %c0_1 = arith.constant 0 : index
    %c0_2 = arith.constant 0 : index
    %1 = vector.load %arg2[%c0_1, %c0_2] : memref<35x128xf32, #tpu.memory_space<vmem>>, vector<35x128xf32>
    %cst = arith.constant dense<0.000000e+00> : vector<8x128xf32>
    %2 = tpu.matmul %0, %1, %cst {dimension_numbers = #tpu.dot_dimension_numbers<[1], [0], [0], [1], [0, 0, 1, 1], [], []>} : vector<8x35xf32>, vector<35x128xf32>, vector<8x128xf32> -> vector<8x128xf32>
    %c0_3 = arith.constant 0 : index
    %c0_4 = arith.constant 0 : index
    %3 = vector.load %arg3[%c0_3, %c0_4] : memref<1x128xf32, #tpu.memory_space<vmem>>, vector<1x128xf32>
    %4 = vector.broadcast %3 : vector<1x128xf32> to vector<8x128xf32>
    %5 = arith.addf %2, %4 : vector<8x128xf32>
    %6 = arith.negf %5 : vector<8x128xf32>
    %7 = math.exp %6 : vector<8x128xf32>
    %cst_5 = arith.constant 1.000000e+00 : f32
    %8 = vector.broadcast %cst_5 : f32 to vector<8x128xf32>
    %9 = arith.addf %8, %7 : vector<8x128xf32>
    %10 = arith.divf %8, %9 : vector<8x128xf32>
    %c0_6 = arith.constant 0 : index
    %c0_7 = arith.constant 0 : index
    %11 = vector.load %arg4[%c0_6, %c0_7] : memref<128x2xf32, #tpu.memory_space<vmem>>, vector<128x2xf32>
    %cst_8 = arith.constant dense<0.000000e+00> : vector<8x2xf32>
    %12 = tpu.matmul %10, %11, %cst_8 {dimension_numbers = #tpu.dot_dimension_numbers<[1], [0], [0], [1], [0, 0, 1, 1], [], []>} : vector<8x128xf32>, vector<128x2xf32>, vector<8x2xf32> -> vector<8x2xf32>
    %c0_9 = arith.constant 0 : index
    %c0_10 = arith.constant 0 : index
    %13 = vector.load %arg5[%c0_9, %c0_10] : memref<1x2xf32, #tpu.memory_space<vmem>>, vector<1x2xf32>
    %14 = vector.broadcast %13 : vector<1x2xf32> to vector<8x2xf32>
    %15 = arith.addf %12, %14 : vector<8x2xf32>
    %c0_11 = arith.constant 0 : index
    %c0_12 = arith.constant 0 : index
    %16 = vector.load %arg6[%c0_11, %c0_12] : memref<8x2xf32, #tpu.memory_space<vmem>>, vector<8x2xf32>
    tpu.vector_store %arg6[%c0_11, %c0_12], %15 {strides = array<i32>} : memref<8x2xf32, #tpu.memory_space<vmem>>, vector<8x2xf32>,
    return
  }
  func.func @transform_0(%arg0: i32) -> (i32, i32) {
    %c0_i32 = arith.constant 0 : i32
    %c0_i32_0 = arith.constant 0 : i32
    return %arg0, %c0_i32 : i32, i32
  }
  func.func @transform_1(%arg0: i32) -> (i32, i32) {
    %c0_i32 = arith.constant 0 : i32
    %c0_i32_0 = arith.constant 0 : i32
    %c0_i32_1 = arith.constant 0 : i32
    return %c0_i32, %c0_i32_0 : i32, i32
  }
  func.func @transform_2(%arg0: i32) -> (i32, i32) {
    %c0_i32 = arith.constant 0 : i32
    %c0_i32_0 = arith.constant 0 : i32
    %c0_i32_1 = arith.constant 0 : i32
    return %c0_i32, %c0_i32_0 : i32, i32
  }
  func.func @transform_3(%arg0: i32) -> (i32, i32) {
    %c0_i32 = arith.constant 0 : i32
    %c0_i32_0 = arith.constant 0 : i32
    %c0_i32_1 = arith.constant 0 : i32
    return %c0_i32, %c0_i32_0 : i32, i32
  }
  func.func @transform_4(%arg0: i32) -> (i32, i32) {
    %c0_i32 = arith.constant 0 : i32
    %c0_i32_0 = arith.constant 0 : i32
    %c0_i32_1 = arith.constant 0 : i32
    return %c0_i32, %c0_i32_0 : i32, i32
  }
  func.func @transform_5(%arg0: i32) -> (i32, i32) {
    %c0_i32 = arith.constant 0 : i32
    %c0_i32_0 = arith.constant 0 : i32
    return %arg0, %c0_i32 : i32, i32
  }
}

</mosaic_0001>

<bundles_post_ra>
// kernel: feedforward_nn.1
= control target key start
LH: loop header
LB: loop body
LE: loop exit
PB: predicated region body
PF: predicated region fallthrough
CT: control target
= control target key end

     0   :  { %vm37_vm0 = vcmask 1042432   ;;  %v298_v0 = vmov 0.0   ;;  %vm299_vm1 = vmmov 0   ;;  %vm33_vm2 = vcmask 285696   ;;  %s428_s1 = inlined_call_operand.vmem [shape: f32[35,128], index: 1, kind: input, shape index: {}]   ;;  %s429_s0 = inlined_call_operand.vmem [shape: f32[8,35], index: 0, kind: input, shape index: {}]   ;;  %s430_s3 = inlined_call_operand.vmem [shape: f32[128,2], index: 3, kind: input, shape index: {}]   ;;  %s431_s2 = inlined_call_operand.vmem [shape: f32[1,128], index: 2, kind: input, shape index: {}]   ;;  %s432_s4 = inlined_call_operand.vmem [shape: f32[1,2], index: 4, kind: input, shape index: {}]   ;;  %s433_s5 = inlined_call_operand.vmem [shape: f32[8,2], index: 5, kind: output, shape index: {}]  }
   0x1   :  { %244 = vmatprep.subr.mxu0 %v298_v0  ;;  %v25_v1 = vld [vmem:[%s428_s1 + $0x20] sm:$0x7]  ;;  %v24_v2 = vld [vmem:[%s428_s1 + $0x18] sm:$0xff]  ;;  %254 = vmatprep.mubr.msk.f32.mxu0 %vm299_vm1, %v298_v0  ;;  %v23_v3 = vld [vmem:[%s428_s1 + $0x10] sm:$0xff]  ;;  %vm210_vm3 = vcmask 15360  }
   0x2   :  { %245 = vmatpush3.msk.msra.mxu0 %vm37_vm0, %v25_v1  ;;  %257 = vmatprep.subr.mxu1 %v298_v0  ;;  %v22_v4 = vld [vmem:[%s428_s1 + $0x8] sm:$0xff]  ;;  %v21_v5 = vld [vmem:[%s428_s1] sm:$0xff]  ;;  %v132_v7 = vld [vmem:[%s430_s3 + $0x78] sm:$0xff] }
   0x3   :  { %246 = vmatprep.subr.mxu0 %v298_v0  ;;  %289 = vmatprep.mubr.msk.f32.mxu1 %vm299_vm1, %v298_v0  ;;  %v20_v6 = vld [vmem:[%s429_s0] sm:$0xff]  ;;  %v131_v8 = vld [vmem:[%s430_s3 + $0x70] sm:$0xff]  ;;  %v130_v9 = vld [vmem:[%s430_s3 + $0x68] sm:$0xff] }
   0x4   :  { %247 = vmatpush3.msra.mxu0 %v24_v2  ;;  %258 = vmatpush3.msra.mxu1 %v132_v7  ;;  %v129_v10 = vld [vmem:[%s430_s3 + $0x60] sm:$0xff]  ;;  %v128_v11 = vld [vmem:[%s430_s3 + $0x58] sm:$0xff]  ;;  %v127_v12 = vld [vmem:[%s430_s3 + $0x50] sm:$0xff] }
   0x5   :  { %248 = vmatprep.subr.mxu0 %v298_v0  ;;  %259 = vmatprep.subr.mxu1 %v298_v0  ;;  %v126_v13 = vld [vmem:[%s430_s3 + $0x48] sm:$0xff]  ;;  %v125_v14 = vld [vmem:[%s430_s3 + $0x40] sm:$0xff]  ;;  %v124_v15 = vld [vmem:[%s430_s3 + $0x38] sm:$0xff] }
   0x6   :  { %249 = vmatpush3.msra.mxu0 %v23_v3  ;;  %260 = vmatpush3.msra.mxu1 %v131_v8  ;;  %v123_v16 = vld [vmem:[%s430_s3 + $0x30] sm:$0xff]  ;;  %v122_v17 = vld [vmem:[%s430_s3 + $0x28] sm:$0xff]  ;;  %v121_v18 = vld [vmem:[%s430_s3 + $0x20] sm:$0xff] }
   0x7   :  { %250 = vmatprep.subr.mxu0 %v298_v0  ;;  %261 = vmatprep.subr.mxu1 %v298_v0  ;;  %v120_v19 = vld [vmem:[%s430_s3 + $0x18] sm:$0xff]  ;;  %v119_v20 = vld [vmem:[%s430_s3 + $0x10] sm:$0xff]  ;;  %v118_v21 = vld [vmem:[%s430_s3 + $0x8] sm:$0xff] }
   0x8   :  { %251 = vmatpush3.msra.mxu0 %v22_v4  ;;  %262 = vmatpush3.msra.mxu1 %v130_v9  ;;  %v117_v22 = vld [vmem:[%s430_s3] sm:$0xff] }
   0x9   :  { %252 = vmatprep.subr.mxu0 %v298_v0  ;;  %263 = vmatprep.subr.mxu1 %v298_v0  ;;  %v216_v23 = vld [vmem:[%s431_s2] ss:$0 sm:$0xff] }
   0xa   :  { %253 = vmatpush3.msra.mxu0 %v21_v5  ;;  %264 = vmatpush3.msra.mxu1 %v129_v10  ;;  %v220_v31 = vld [vmem:[%s432_s4] ss:$0 sm:$0xff] }
   0xb   :  { %255 = vmatmul.mubr.msk.f32.vlgmr.msra.gmra.mxu0 %vm33_vm2, %v20_v6  ;;  %265 = vmatprep.subr.mxu1 %v298_v0 }
   0xc   :  { %266 = vmatpush3.msra.mxu1 %v128_v11 }
   0xd   :  { %267 = vmatprep.subr.mxu1 %v298_v0 }
   0xe   :  { %268 = vmatpush3.msra.mxu1 %v127_v12 }
   0xf   :  { %269 = vmatprep.subr.mxu1 %v298_v0 }
  0x10   :  { %270 = vmatpush3.msra.mxu1 %v126_v13 }
  0x11   :  { %271 = vmatprep.subr.mxu1 %v298_v0 }
  0x12   :  { %272 = vmatpush3.msra.mxu1 %v125_v14 }
  0x13   :  { %273 = vmatprep.subr.mxu1 %v298_v0 }
  0x14   :  { %274 = vmatpush3.msra.mxu1 %v124_v15 }
  0x15   :  { %275 = vmatprep.subr.mxu1 %v298_v0 }
  0x16   :  { %276 = vmatpush3.msra.mxu1 %v123_v16 }
  0x17   :  { %277 = vmatprep.subr.mxu1 %v298_v0 }
  0x18   :  { %278 = vmatpush3.msra.mxu1 %v122_v17 }
  0x19   :  { %279 = vmatprep.subr.mxu1 %v298_v0 }
  0x1a   :  { %280 = vmatpush3.msra.mxu1 %v121_v18 }
  0x1b   :  { %281 = vmatprep.subr.mxu1 %v298_v0 }
  0x1c   :  { %282 = vmatpush3.msra.mxu1 %v120_v19 }
  0x1d   :  { %283 = vmatprep.subr.mxu1 %v298_v0 }
  0x1e   :  { %284 = vmatpush3.msra.mxu1 %v119_v20 }
  0x1f   :  { %285 = vmatprep.subr.mxu1 %v298_v0 }
  0x20   :  { %286 = vmatpush3.msra.mxu1 %v118_v21 }
  0x21   :  { %287 = vmatprep.subr.mxu1 %v298_v0 }
  0x22   :  { %288 = vmatpush3.msra.mxu1 %v117_v22 }
  0xcb   :  { %v107_v24 = vpop.f32.mrf.mxu0 }
  0xcc   :  { %v108_v25 = vadd.f32 %v216_v23, %v107_v24 }
  0xcd   :  { %v256_v26 = vpop.f32.mrf.mxu0 }
  0xce   :  { %v219_v27 = vmul.f32 -1.442695, %v108_v25 }
  0xd0   :  { %294 = vpow2.f32 %v219_v27 }
  0xdd   :  { %v295_v28 = vpop.eup %294 }
  0xde   :  { %v114_v29 = vadd.f32 1.0, %v295_v28 }
  0xe0   :  { %296 = vrcp.f32 %v114_v29 }
  0xed   :  { %v297_v30 = vpop.eup %296 }
  0xee   :  { %290 = vmatmul.mubr.f32.vlgmr.msra.gmra.mxu1 %v297_v30 }
 0x1ae   :  { %v206_v32 = vpop.f32.mrf.mxu1 }
 0x1af   :  { %v207_v33 = vadd.f32 %v220_v31, %v206_v32 }
 0x1b0   :  { %v291_v34 = vpop.f32.mrf.mxu1 }
 0x1b1   :  { %211 = vst.msk [vmem:[%s433_s5] sm:$0xff] %vm210_vm3, %v207_v33 }

</bundles_post_ra>
